<compile_context>
chip_gen: v5e
topology: v5e:2x2
jax: 0.10.0
libtpu: 0.0.40
codegen_flags: <defaults>
</compile_context>

<pallas_src>
import math

import jax
import jax.numpy as jnp
from jax.experimental import pallas as pl
from jax.experimental.pallas import tpu as pltpu

NUM_CHAMPS = 163
NUM_ROLES = 5
_ROLE_PACK = 8          # power-of-two >= role vocab (6): cheap shift/mask decode


def set_element_kernel(idx_ref, cw1_ref, rw1_ref, w2_ref, b2_ref, out_ref):
    # idx_ref : [TILE, 1] int32, packed champ*8 + role
    # cw1_ref : [164, 17]  (champ_emb @ W1[:32] + b1)
    # rw1_ref : [6, 17]    (role_emb  @ W1[32:])
    # w2_ref  : [17, 10], b2_ref : [1, 10]
    # out_ref : [TILE, 10] float32
    tile = idx_ref.shape[0]
    c_vocab = cw1_ref.shape[0]
    r_vocab = rw1_ref.shape[0]

    packed = idx_ref[...]                                   # [TILE, 1]
    champ_idx = jnp.right_shift(packed, 3)                  # [TILE, 1]
    role_idx = jnp.bitwise_and(packed, _ROLE_PACK - 1)      # [TILE, 1]

    # Champion embedding + folded Linear1 + b1 as an exact one-hot gather (MXU).
    c_iota = jax.lax.broadcasted_iota(jnp.int32, (tile, c_vocab), 1)
    c_onehot = (c_iota == champ_idx).astype(jnp.float32)    # [TILE, 164]
    h = jnp.dot(c_onehot, cw1_ref[...],
                preferred_element_type=jnp.float32)         # [TILE, 17]

    # Role contribution: 6-way select-accumulate on the VPU (a K=6 matmul is
    # almost all MXU fill/drain + result-FIFO latency, so keep it off the MXU).
    rw1 = rw1_ref[...]                                      # [6, 17]
    for k in range(r_vocab):                                # static unroll (6)
        mask = (role_idx == k).astype(jnp.float32)          # [TILE, 1]
        h = h + mask * rw1[k:k + 1, :]                      # [TILE, 17]

    h = jnp.maximum(h, 0.0)                                 # ReLU
    y = jnp.dot(h, w2_ref[...], preferred_element_type=jnp.float32) + b2_ref[...]
    out_ref[...] = y


def set_element_process_network(champions, roles, params, *, max_tile=1024):
    """champions, roles: int [B, S].  Returns float32 [B, S, outputSize]."""
    B, S = champions.shape
    N = B * S
    c_size = params["champ_emb"].shape[1]
    out_size = params["w2"].shape[1]

    # Parameter-only preprocessing: fold Linear1 into the embedding tables.
    cw1 = (params["champ_emb"] @ params["w1"][:c_size, :]
           + params["b1"]).astype(jnp.float32)              # [164, 17]
    rw1 = (params["role_emb"] @ params["w1"][c_size:, :]).astype(jnp.float32)  # [6, 17]
    w2 = params["w2"].astype(jnp.float32)                   # [17, 10]
    b2 = params["b2"].astype(jnp.float32)                   # [1, 10]

    # Single packed int32 index stream: one DMA / one narrow load per tile.
    packed = (champions.astype(jnp.int32) * _ROLE_PACK
              + roles.astype(jnp.int32)).reshape(N, 1)

    # Tile the flattened token axis; pad N to a whole number of tiles so the
    # last block never reads unspecified data (padded rows use valid index 0
    # and are sliced off below).
    tile = min(max_tile, pl.cdiv(N, 8) * 8)
    n_pad = pl.cdiv(N, tile) * tile
    if n_pad != N:
        packed = jnp.pad(packed, ((0, n_pad - N), (0, 0)))

    grid = (n_pad // tile,)
    const = lambda i: (0, 0)    # weights/tables stay VMEM-resident across steps

    out = pl.pallas_call(
        set_element_kernel,
        out_shape=jax.ShapeDtypeStruct((n_pad, out_size), jnp.float32),
        grid_spec=pltpu.PrefetchScalarGridSpec(
            num_scalar_prefetch=0,
            grid=grid,
            in_specs=[
                pl.BlockSpec((tile, 1), lambda i: (i, 0)),
                pl.BlockSpec(cw1.shape, const),
                pl.BlockSpec(rw1.shape, const),
                pl.BlockSpec(w2.shape, const),
                pl.BlockSpec(b2.shape, const),
            ],
            out_specs=pl.BlockSpec((tile, out_size), lambda i: (i, 0)),
        ),
        compiler_params=pltpu.CompilerParams(
            dimension_semantics=("parallel",)),   # shards across v7x's 2 TCs
    )(packed, cw1, rw1, w2, b2)

    return out[:N].reshape(B, S, out_size)


def init_params(key, champion_embedding_size=32, role_embedding_size=3,
                output_size=10):
    half_input = math.floor((champion_embedding_size + role_embedding_size) / 2)
    in_size = champion_embedding_size + role_embedding_size
    k = jax.random.split(key, 6)
    params = {
        "champ_emb": jax.random.normal(k[0], (NUM_CHAMPS + 1, champion_embedding_size),
                                       jnp.float32),
        "role_emb": jax.random.normal(k[1], (NUM_ROLES + 1, role_embedding_size),
                                      jnp.float32),
        # Linear weights stored transposed relative to PyTorch ([in, out]).
        "w1": jax.random.uniform(k[2], (in_size, half_input), jnp.float32,
                                 minval=-1.0 / math.sqrt(in_size),
                                 maxval=1.0 / math.sqrt(in_size)),
        "b1": jax.random.uniform(k[3], (1, half_input), jnp.float32,
                                 minval=-1.0 / math.sqrt(in_size),
                                 maxval=1.0 / math.sqrt(in_size)),
        "w2": jax.random.uniform(k[4], (half_input, output_size), jnp.float32,
                                 minval=-1.0 / math.sqrt(half_input),
                                 maxval=1.0 / math.sqrt(half_input)),
        "b2": jax.random.uniform(k[5], (1, output_size), jnp.float32,
                                 minval=-1.0 / math.sqrt(half_input),
                                 maxval=1.0 / math.sqrt(half_input)),
    }
    return params


def reference_forward(champions, roles, params):
    c = params["champ_emb"][champions]            # [B, S, 32]
    r = params["role_emb"][roles]                 # [B, S, 3]
    x = jnp.concatenate([c, r], axis=2)           # [B, S, 35]
    h = jnp.maximum(x @ params["w1"] + params["b1"][0], 0.0)
    return h @ params["w2"] + params["b2"][0]


if __name__ == "__main__":
    key = jax.random.PRNGKey(0)
    kp, kc, kr = jax.random.split(key, 3)

    params = init_params(kp)

    B, S = 2, 5   # batch of 2 teams, 5 set elements (one per role)
    champions = jax.random.randint(kc, (B, S), 0, NUM_CHAMPS + 1, dtype=jnp.int32)
    roles = jax.random.randint(kr, (B, S), 0, NUM_ROLES + 1, dtype=jnp.int32)

    out = set_element_process_network(champions, roles, params)
    out = jax.block_until_ready(out)

    ref = reference_forward(champions, roles, params)
    assert out.shape == (B, S, 10)
    assert jnp.allclose(out, ref, atol=1e-4, rtol=1e-4)

    print("KERNEL_OK")
</pallas_src>

<mosaic_0001>
module attributes {stable_mosaic.version = 11 : i64} {
  func.func @set_element_kernel(%arg0: i32, %arg1: memref<16x1xi32, #tpu.memory_space<vmem>>, %arg2: memref<164x17xf32, #tpu.memory_space<vmem>>, %arg3: memref<6x17xf32, #tpu.memory_space<vmem>>, %arg4: memref<17x10xf32, #tpu.memory_space<vmem>>, %arg5: memref<1x10xf32, #tpu.memory_space<vmem>>, %arg6: memref<16x10xf32, #tpu.memory_space<vmem>>) attributes {dimension_semantics = [#tpu.dimension_semantics<parallel>], iteration_bounds = array<i64: 1>, scalar_prefetch = 0 : i64, scratch_operands = 0 : i64, tpu.core_type = #tpu.core_type<tc>, window_params = [{transform_indices = @transform_0, window_bounds = array<i64: 16, 1>}, {pipeline_mode = #tpu.pipeline_mode<synchronous>, transform_indices = @transform_1, window_bounds = array<i64: 164, 17>}, {pipeline_mode = #tpu.pipeline_mode<synchronous>, transform_indices = @transform_2, window_bounds = array<i64: 6, 17>}, {pipeline_mode = #tpu.pipeline_mode<synchronous>, transform_indices = @transform_3, window_bounds = array<i64: 17, 10>}, {pipeline_mode = #tpu.pipeline_mode<synchronous>, transform_indices = @transform_4, window_bounds = array<i64: 1, 10>}, {transform_indices = @transform_5, window_bounds = array<i64: 16, 10>}]} {
    %c0 = arith.constant 0 : index
    %c0_0 = arith.constant 0 : index
    %0 = vector.load %arg1[%c0, %c0_0] : memref<16x1xi32, #tpu.memory_space<vmem>>, vector<16x1xi32>
    %c3_i32 = arith.constant 3 : i32
    %1 = vector.broadcast %c3_i32 : i32 to vector<16x1xi32>
    %2 = arith.shrsi %0, %1 : vector<16x1xi32>
    %c7_i32 = arith.constant 7 : i32
    %3 = vector.broadcast %c7_i32 : i32 to vector<16x1xi32>
    %4 = arith.andi %0, %3 : vector<16x1xi32>
    %5 = tpu.iota {dimensions = array<i32: 1>} : vector<16x164xi32>
    %6 = vector.broadcast %2 : vector<16x1xi32> to vector<16x164xi32>
    %7 = arith.cmpi eq, %5, %6 : vector<16x164xi32>
    %8 = arith.extui %7 : vector<16x164xi1> to vector<16x164xi32>
    %9 = arith.sitofp %8 : vector<16x164xi32> to vector<16x164xf32>
    %c0_1 = arith.constant 0 : index
    %c0_2 = arith.constant 0 : index
    %10 = vector.load %arg2[%c0_1, %c0_2] : memref<164x17xf32, #tpu.memory_space<vmem>>, vector<164x17xf32>
    %cst = arith.constant dense<0.000000e+00> : vector<16x17xf32>
    %11 = tpu.matmul %9, %10, %cst {dimension_numbers = #tpu.dot_dimension_numbers<[1], [0], [0], [1], [0, 0, 1, 1], [], []>} : vector<16x164xf32>, vector<164x17xf32>, vector<16x17xf32> -> vector<16x17xf32>
    %c0_3 = arith.constant 0 : index
    %c0_4 = arith.constant 0 : index
    %12 = vector.load %arg3[%c0_3, %c0_4] : memref<6x17xf32, #tpu.memory_space<vmem>>, vector<6x17xf32>
    %c0_i32 = arith.constant 0 : i32
    %13 = vector.broadcast %c0_i32 : i32 to vector<16x1xi32>
    %14 = arith.cmpi eq, %4, %13 : vector<16x1xi32>
    %15 = arith.extui %14 : vector<16x1xi1> to vector<16x1xi32>
    %16 = arith.sitofp %15 : vector<16x1xi32> to vector<16x1xf32>
    %17 = vector.extract_strided_slice %12 {offsets = [0, 0], sizes = [1, 17], strides = [1, 1]} : vector<6x17xf32> to vector<1x17xf32>
    %18 = vector.broadcast %16 : vector<16x1xf32> to vector<16x17xf32>
    %19 = vector.broadcast %17 : vector<1x17xf32> to vector<16x17xf32>
    %20 = arith.mulf %18, %19 : vector<16x17xf32>
    %21 = arith.addf %11, %20 : vector<16x17xf32>
    %c1_i32 = arith.constant 1 : i32
    %22 = vector.broadcast %c1_i32 : i32 to vector<16x1xi32>
    %23 = arith.cmpi eq, %4, %22 : vector<16x1xi32>
    %24 = arith.extui %23 : vector<16x1xi1> to vector<16x1xi32>
    %25 = arith.sitofp %24 : vector<16x1xi32> to vector<16x1xf32>
    %26 = vector.extract_strided_slice %12 {offsets = [1, 0], sizes = [1, 17], strides = [1, 1]} : vector<6x17xf32> to vector<1x17xf32>
    %27 = vector.broadcast %25 : vector<16x1xf32> to vector<16x17xf32>
    %28 = vector.broadcast %26 : vector<1x17xf32> to vector<16x17xf32>
    %29 = arith.mulf %27, %28 : vector<16x17xf32>
    %30 = arith.addf %21, %29 : vector<16x17xf32>
    %c2_i32 = arith.constant 2 : i32
    %31 = vector.broadcast %c2_i32 : i32 to vector<16x1xi32>
    %32 = arith.cmpi eq, %4, %31 : vector<16x1xi32>
    %33 = arith.extui %32 : vector<16x1xi1> to vector<16x1xi32>
    %34 = arith.sitofp %33 : vector<16x1xi32> to vector<16x1xf32>
    %35 = vector.extract_strided_slice %12 {offsets = [2, 0], sizes = [1, 17], strides = [1, 1]} : vector<6x17xf32> to vector<1x17xf32>
    %36 = vector.broadcast %34 : vector<16x1xf32> to vector<16x17xf32>
    %37 = vector.broadcast %35 : vector<1x17xf32> to vector<16x17xf32>
    %38 = arith.mulf %36, %37 : vector<16x17xf32>
    %39 = arith.addf %30, %38 : vector<16x17xf32>
    %c3_i32_5 = arith.constant 3 : i32
    %40 = vector.broadcast %c3_i32_5 : i32 to vector<16x1xi32>
    %41 = arith.cmpi eq, %4, %40 : vector<16x1xi32>
    %42 = arith.extui %41 : vector<16x1xi1> to vector<16x1xi32>
    %43 = arith.sitofp %42 : vector<16x1xi32> to vector<16x1xf32>
    %44 = vector.extract_strided_slice %12 {offsets = [3, 0], sizes = [1, 17], strides = [1, 1]} : vector<6x17xf32> to vector<1x17xf32>
    %45 = vector.broadcast %43 : vector<16x1xf32> to vector<16x17xf32>
    %46 = vector.broadcast %44 : vector<1x17xf32> to vector<16x17xf32>
    %47 = arith.mulf %45, %46 : vector<16x17xf32>
    %48 = arith.addf %39, %47 : vector<16x17xf32>
    %c4_i32 = arith.constant 4 : i32
    %49 = vector.broadcast %c4_i32 : i32 to vector<16x1xi32>
    %50 = arith.cmpi eq, %4, %49 : vector<16x1xi32>
    %51 = arith.extui %50 : vector<16x1xi1> to vector<16x1xi32>
    %52 = arith.sitofp %51 : vector<16x1xi32> to vector<16x1xf32>
    %53 = vector.extract_strided_slice %12 {offsets = [4, 0], sizes = [1, 17], strides = [1, 1]} : vector<6x17xf32> to vector<1x17xf32>
    %54 = vector.broadcast %52 : vector<16x1xf32> to vector<16x17xf32>
    %55 = vector.broadcast %53 : vector<1x17xf32> to vector<16x17xf32>
    %56 = arith.mulf %54, %55 : vector<16x17xf32>
    %57 = arith.addf %48, %56 : vector<16x17xf32>
    %c5_i32 = arith.constant 5 : i32
    %58 = vector.broadcast %c5_i32 : i32 to vector<16x1xi32>
    %59 = arith.cmpi eq, %4, %58 : vector<16x1xi32>
    %60 = arith.extui %59 : vector<16x1xi1> to vector<16x1xi32>
    %61 = arith.sitofp %60 : vector<16x1xi32> to vector<16x1xf32>
    %62 = vector.extract_strided_slice %12 {offsets = [5, 0], sizes = [1, 17], strides = [1, 1]} : vector<6x17xf32> to vector<1x17xf32>
    %63 = vector.broadcast %61 : vector<16x1xf32> to vector<16x17xf32>
    %64 = vector.broadcast %62 : vector<1x17xf32> to vector<16x17xf32>
    %65 = arith.mulf %63, %64 : vector<16x17xf32>
    %66 = arith.addf %57, %65 : vector<16x17xf32>
    %cst_6 = arith.constant 0.000000e+00 : f32
    %67 = vector.broadcast %cst_6 : f32 to vector<16x17xf32>
    %68 = arith.maximumf %66, %67 : vector<16x17xf32>
    %c0_7 = arith.constant 0 : index
    %c0_8 = arith.constant 0 : index
    %69 = vector.load %arg4[%c0_7, %c0_8] : memref<17x10xf32, #tpu.memory_space<vmem>>, vector<17x10xf32>
    %cst_9 = arith.constant dense<0.000000e+00> : vector<16x10xf32>
    %70 = tpu.matmul %68, %69, %cst_9 {dimension_numbers = #tpu.dot_dimension_numbers<[1], [0], [0], [1], [0, 0, 1, 1], [], []>} : vector<16x17xf32>, vector<17x10xf32>, vector<16x10xf32> -> vector<16x10xf32>
    %c0_10 = arith.constant 0 : index
    %c0_11 = arith.constant 0 : index
    %71 = vector.load %arg5[%c0_10, %c0_11] : memref<1x10xf32, #tpu.memory_space<vmem>>, vector<1x10xf32>
    %72 = vector.broadcast %71 : vector<1x10xf32> to vector<16x10xf32>
    %73 = arith.addf %70, %72 : vector<16x10xf32>
    %c0_12 = arith.constant 0 : index
    %c0_13 = arith.constant 0 : index
    %74 = vector.load %arg6[%c0_12, %c0_13] : memref<16x10xf32, #tpu.memory_space<vmem>>, vector<16x10xf32>
    tpu.vector_store %arg6[%c0_12, %c0_13], %73 {strides = array<i32>} : memref<16x10xf32, #tpu.memory_space<vmem>>, vector<16x10xf32>,
    return
  }
  func.func @transform_0(%arg0: i32) -> (i32, i32) {
    %c0_i32 = arith.constant 0 : i32
    %c0_i32_0 = arith.constant 0 : i32
    return %arg0, %c0_i32 : i32, i32
  }
  func.func @transform_1(%arg0: i32) -> (i32, i32) {
    %c0_i32 = arith.constant 0 : i32
    %c0_i32_0 = arith.constant 0 : i32
    %c0_i32_1 = arith.constant 0 : i32
    return %c0_i32, %c0_i32_0 : i32, i32
  }
  func.func @transform_2(%arg0: i32) -> (i32, i32) {
    %c0_i32 = arith.constant 0 : i32
    %c0_i32_0 = arith.constant 0 : i32
    %c0_i32_1 = arith.constant 0 : i32
    return %c0_i32, %c0_i32_0 : i32, i32
  }
  func.func @transform_3(%arg0: i32) -> (i32, i32) {
    %c0_i32 = arith.constant 0 : i32
    %c0_i32_0 = arith.constant 0 : i32
    %c0_i32_1 = arith.constant 0 : i32
    return %c0_i32, %c0_i32_0 : i32, i32
  }
  func.func @transform_4(%arg0: i32) -> (i32, i32) {
    %c0_i32 = arith.constant 0 : i32
    %c0_i32_0 = arith.constant 0 : i32
    %c0_i32_1 = arith.constant 0 : i32
    return %c0_i32, %c0_i32_0 : i32, i32
  }
  func.func @transform_5(%arg0: i32) -> (i32, i32) {
    %c0_i32 = arith.constant 0 : i32
    %c0_i32_0 = arith.constant 0 : i32
    return %arg0, %c0_i32 : i32, i32
  }
}

</mosaic_0001>

<bundles_post_ra>
// kernel: tpu_custom_call.1
= control target key start
LH: loop header
LB: loop body
LE: loop exit
PB: predicated region body
PF: predicated region fallthrough
CT: control target
= control target key end

     0   :  { %v421_v2 = vmov 0   ;;  %vm96_vm0 = vcmask 1043456   ;;  %v422_v9 = vmov 0.0   ;;  %s576_s0 = inlined_call_operand.vmem [shape: s32[16,1], index: 0, kind: input, shape index: {}]   ;;  %s577_s1 = inlined_call_operand.vmem [shape: f32[164,17], index: 1, kind: input, shape index: {}]   ;;  %s578_s2 = inlined_call_operand.vmem [shape: f32[6,17], index: 2, kind: input, shape index: {}]   ;;  %s579_s3 = inlined_call_operand.vmem [shape: f32[17,10], index: 3, kind: input, shape index: {}]   ;;  %s580_s4 = inlined_call_operand.vmem [shape: f32[1,10], index: 4, kind: input, shape index: {}]   ;;  %s581_s5 = inlined_call_operand.hbm [shape: f32[16,10], index: 5, kind: output, shape index: {}]  }
   0x1   :  { %v21_v0 = vld [vmem:[%s576_s0] sm:$0xff]  ;;  %v63_v1 = vld [vmem:[%s577_s1 + $0x78] sm:$0xff]  ;;  %361 = vset.pattern.permute.xlu0 %v421_v2  ;;  %v62_v5 = vld [vmem:[%s577_s1 + $0x70] sm:$0xff]  ;;  %362 = vset.pattern.permute.xlu1 %v421_v2 }
   0x2   :  { %v23_v3 = vshra.s32 %v21_v0, 3  ;;  %v463_v4 = vand.u32 7, %v21_v0  ;;  %100 = vmatpush.msra.mxu0 %v63_v1  ;;  %v61_v6 = vld [vmem:[%s577_s1 + $0x68] sm:$0xff]  ;;  %339 = vmatpush.msra.mxu3 %v63_v1  ;;  %v60_v8 = vld [vmem:[%s577_s1 + $0x60] sm:$0xff]  ;;  %v67_v13 = vld [vmem:[%s577_s1 + $0x98] sm:$0xff] }
   0x3   :  { %v22_v7 = vld [vmem:[%s576_s0 + $0x8] sm:$0xff]  ;;  %373 = vset.pattern.permute.xlu2 %v421_v2  ;;  %v68_v12 = vld [vmem:[%s577_s1 + $0xa0] sm:$0xf]  ;;  %v59_v14 = vld [vmem:[%s577_s1 + $0x58] sm:$0xff] }
   0x4   :  { %31 = vperm.xlu0 %361, %v23_v3   ;;  %101 = vmatpush.msra.mxu0 %v62_v5  ;;  %vm70_vm1 = vcmp.eq.s32.totalorder %v463_v4, 0  ;;  %v479_v11 = vand.u32 7, %v22_v7  ;;  %vm146_vm2 = vcmp.eq.s32.totalorder %v463_v4, 1  ;;  %v24_v16 = vshra.s32 %v22_v7, 3  ;;  %v66_v18 = vld [vmem:[%s577_s1 + $0x90] sm:$0xff] }
   0x5   :  { %340 = vmatpush.msra.mxu3 %v62_v5  ;;  %v319_v10 = vsel %vm70_vm1, 1.0, %v422_v9  ;;  %323 = vmatpush.msk.msra.mxu1 %vm96_vm0, %v68_v12  ;;  %v326_v15 = vsel %vm146_vm2, 1.0, %v422_v9 }
   0x6   :  { %102 = vmatpush.msra.mxu0 %v61_v6  ;;  %v363_v17 = vpack.i.bf16 %v326_v15, %v319_v10 }
   0x7   :  { %341 = vmatpush.msra.mxu3 %v61_v6 }
   0x8   :  { %103 = vmatpush.msra.mxu0 %v60_v8 }
   0x9   :  { %10 = vsyncpa [#allocation3], 0  ;;  %v58_v19 = vld [vmem:[%s577_s1 + $0x50] sm:$0xff]  ;;  %342 = vmatpush.msra.mxu3 %v60_v8  ;;  %135 = vmatpush.msra.mxu1 %v67_v13  ;;  %vm168_vm3 = vcmp.eq.s32.totalorder %v479_v11, 2  ;;  %vm189_vm4 = vcmp.eq.s32.totalorder %v479_v11, 3  ;;  %v65_v20 = vld [vmem:[%s577_s1 + $0x88] sm:$0xff]  ;;  %v27_v43 = vlaneseq }
   0xa   :  { %104 = vmatpush.msra.mxu0 %v59_v14  ;;  %364 = vperm.xlu1 %362, %v363_v17   ;;  %v57_v21 = vld [vmem:[%s577_s1 + $0x48] sm:$0xff]  ;;  %v329_v22 = vsel %vm168_vm3, 1.0, %v422_v9  ;;  %v331_v23 = vsel %vm189_vm4, 1.0, %v422_v9  ;;  %v56_v24 = vld [vmem:[%s577_s1 + $0x40] sm:$0xff]  ;;  %v55_v25 = vld [vmem:[%s577_s1 + $0x38] sm:$0xff]  ;;  %vm71_vm5 = vcmp.eq.s32.totalorder %v479_v11, 0 }
   0xb   :  { %343 = vmatpush.msra.mxu3 %v59_v14  ;;  %136 = vmatpush.msra.mxu1 %v66_v18  ;;  %v384_v26 = vpack.i.bf16 %v331_v23, %v329_v22  ;;  %v54_v27 = vld [vmem:[%s577_s1 + $0x30] sm:$0xff]  ;;  %v53_v28 = vld [vmem:[%s577_s1 + $0x28] sm:$0xff]  ;;  %v52_v29 = vld [vmem:[%s577_s1 + $0x20] sm:$0xff]  ;;  %vm167_vm6 = vcmp.eq.s32.totalorder %v463_v4, 2  ;;  %v320_v35 = vsel %vm71_vm5, 1.0, %v422_v9  ;;  %vm210_vm7 = vcmp.eq.s32.totalorder %v479_v11, 4 }
   0xc   :  { %34 = vperm.xlu0 %361, %v24_v16   ;;  %105 = vmatpush.msra.mxu0 %v58_v19  ;;  %v51_v30 = vld [vmem:[%s577_s1 + $0x18] sm:$0xff]  ;;  %v50_v31 = vld [vmem:[%s577_s1 + $0x10] sm:$0xff]  ;;  %v49_v32 = vld [vmem:[%s577_s1 + $0x8] sm:$0xff]  ;;  %v328_v36 = vsel %vm167_vm6, 1.0, %v422_v9  ;;  %vm231_vm8 = vcmp.eq.s32.totalorder %v479_v11, 5  ;;  %v333_v38 = vsel %vm210_vm7, 1.0, %v422_v9 }
   0xd   :  { %344 = vmatpush.msra.mxu3 %v58_v19  ;;  %137 = vmatpush.msra.mxu1 %v65_v20  ;;  %v48_v33 = vld [vmem:[%s577_s1] sm:$0xff]  ;;  %v368_v37 = vpack.i.bf16 %v320_v35, %v328_v36  ;;  %v335_v39 = vsel %vm231_vm8, 1.0, %v422_v9  ;;  %vm188_vm9 = vcmp.eq.s32.totalorder %v463_v4, 3  ;;  %vm209_vm10 = vcmp.eq.s32.totalorder %v463_v4, 4  ;;  %v255_v55 = vld [vmem:[%s579_s3 + $0x10] sm:$0x1] }
   0xe   :  { %106 = vmatpush.msra.mxu0 %v57_v21  ;;  %v64_v34 = vld [vmem:[%s577_s1 + $0x80] sm:$0xff]  ;;  %v389_v40 = vpack.i.bf16 %v335_v39, %v333_v38  ;;  %v330_v41 = vsel %vm188_vm9, 1.0, %v422_v9  ;;  %v332_v42 = vsel %vm209_vm10, 1.0, %v422_v9  ;;  %vm147_vm11 = vcmp.eq.s32.totalorder %v479_v11, 1  ;;  %v254_v56 = vld [vmem:[%s579_s3 + $0x8] sm:$0xff]  ;;  %s424_s19 = smov [#allocation2]  }
   0xf   :  { %345 = vmatpush.msra.mxu3 %v57_v21  ;;  %138 = vmatpush.msra.mxu1 %v64_v34  ;;  %v374_v44 = vpack.i.bf16 %v332_v42, %v330_v41  ;;  %vm230_vm12 = vcmp.eq.s32.totalorder %v463_v4, 5  ;;  %v327_v45 = vsel %vm147_vm11, 1.0, %v422_v9  ;;  %v28_v47 = vand.u32 127, %v27_v43  ;;  %v253_v57 = vld [vmem:[%s579_s3] sm:$0xff]  ;;  %s301_s20 = sshll.u32 %s424_s19, 4  ;;  %s303_s23 = sshll.u32 %s581_s5, 4  ;;  %s302_s20 = int_to_ptr.vmem [resolvable:$true] %s301_s20  ;;  %s304_s23 = int_to_ptr.hbm [resolvable:$true] %s303_s23 }
  0x10   :  { %107 = vmatpush.msra.mxu0 %v56_v24  ;;  %v334_v46 = vsel %vm230_vm12, 1.0, %v422_v9  ;;  %vm89_vm13 = vcmask 293888   ;;  %v423_v51 = vmov 1.0   ;;  %vm267_vm2 = vcmask 1040384   ;;  %v69_v59 = vld [vmem:[%s578_s2] sm:$0x3f] }
  0x11   :  { %346 = vmatpush.msra.mxu3 %v56_v24  ;;  %375 = vperm.xlu2 %373, %v374_v44   ;;  %v379_v48 = vpack.i.bf16 %v334_v46, %v327_v45  ;;  %v29_v49 = vadd.s32 128, %v28_v47  ;;  %v86_v61 = vperm.slane %v69_v59, 0  ;;  %v162_v63 = vperm.slane %v69_v59, 1  ;;  %s425_s24 = smov 128   ;;  %s426_s25 = smov 8  }
  0x12   :  { %108 = vmatpush.msra.mxu0 %v55_v25  ;;  %369 = vperm.xlu1 %362, %v368_v37   ;;  %v204_v10 = vperm.slane %v69_v59, 3  ;;  %v225_v15 = vperm.slane %v69_v59, 4  ;;  %v246_v22 = vperm.slane %v69_v59, 5  ;;  %vm260_vm3 = vcmask 138240  }
  0x13   :  { %347 = vmatpush.msra.mxu3 %v55_v25  ;;  %336 = vmatpush.msk.msra.mxu2 %vm267_vm2, %v255_v55  ;;  %vm294_vm4 = vcmask 80896  }
  0x14   :  { %385 = vperm.xlu0 %361, %v384_v26   ;;  %109 = vmatpush.msra.mxu0 %v54_v27 }
  0x15   :  { %348 = vmatpush.msra.mxu3 %v54_v27  ;;  %285 = vmatpush.msra.mxu2 %v254_v56 }
  0x16   :  { %110 = vmatpush.msra.mxu0 %v53_v28 }
  0x17   :  { %349 = vmatpush.msra.mxu3 %v53_v28  ;;  %286 = vmatpush.msra.mxu2 %v253_v57 }
  0x18   :  { %111 = vmatpush.msra.mxu0 %v52_v29 }
  0x19   :  { %350 = vmatpush.msra.mxu3 %v52_v29  ;;  %380 = vperm.xlu2 %373, %v379_v48  }
  0x1a   :  { %112 = vmatpush.msra.mxu0 %v51_v30  ;;  %390 = vperm.xlu1 %362, %v389_v40  }
  0x1b   :  { %351 = vmatpush.msra.mxu3 %v51_v30 }
  0x1c   :  { %113 = vmatpush.msra.mxu0 %v50_v31 }
  0x1d   :  { %352 = vmatpush.msra.mxu3 %v50_v31 }
  0x1e   :  { %114 = vmatpush.msra.mxu0 %v49_v32 }
  0x1f   :  { %353 = vmatpush.msra.mxu3 %v49_v32 }
  0x20   :  { %115 = vmatpush.msra.mxu0 %v48_v33 }
  0x21   :  { %354 = vmatpush.msra.mxu3 %v48_v33 }
  0x6b   :  { %v376_v62 = vpop.permute.xlu2 %375 }
  0x6c   :  { %v377_v6 = vunpack.i.l.bf16 %v376_v62  ;;  %v378_v11 = vunpack.i.h.bf16 %v376_v62 }
  0x6e   :  { %v205_v16 = vmul.f32 %v377_v6, %v204_v10  ;;  %v226_v18 = vmul.f32 %v378_v11, %v225_v15 }
  0x73   :  { %v381_v13 = vpop.permute.xlu2 %380 }
  0x74   :  { %v383_v20 = vunpack.i.h.bf16 %v381_v13  ;;  %v382_v27 = vunpack.i.l.bf16 %v381_v13 }
  0x76   :  { %v32_v50 = vpop.permute.xlu0 %31  ;;  %v247_v24 = vmul.f32 %v383_v20, %v246_v22  ;;  %v164_v37 = vmul.f32 %v382_v27, %v162_v63 }
  0x77   :  { %vm37_vm14 = vcmp.eq.s32.totalorder %v29_v49, %v32_v50  ;;  %vm36_vm15 = vcmp.eq.s32.totalorder %v28_v47, %v32_v50 }
  0x78   :  { %321 = vmatmul.msk.f32.vlgmr.msra.gmra.mxu0 %vm36_vm15, %v423_v51  ;;  %v316_v52 = vsel %vm37_vm14, 1.0, %v422_v9 }
  0x79   :  { %324 = vmatmul.msk.f32.vlgmr.msra.gmra.mxu1 %vm89_vm13, %v316_v52 }
  0x7c   :  { %v365_v58 = vpop.permute.xlu1 %364 }
  0x7d   :  { %v366_v60 = vunpack.i.l.bf16 %v365_v58  ;;  %v367_v0 = vunpack.i.h.bf16 %v365_v58 }
  0x7e   :  { %v35_v53 = vpop.permute.xlu0 %34 }
  0x7f   :  { %vm39_vm0 = vcmp.eq.s32.totalorder %v29_v49, %v35_v53  ;;  %vm38_vm1 = vcmp.eq.s32.totalorder %v28_v47, %v35_v53  ;;  %v87_v1 = vmul.f32 %v366_v60, %v86_v61  ;;  %v163_v4 = vmul.f32 %v367_v0, %v162_v63 }
  0x80   :  { %322 = vmatmul.msk.f32.vlgmr.msra.gmra.mxu3 %vm38_vm1, %v423_v51  ;;  %v318_v54 = vsel %vm39_vm0, 1.0, %v422_v9  ;;  %v183_v9 = vperm.slane %v69_v59, 2  ;;  %v394_v51 = vld [vmem:[%s580_s4] ss:$0 sm:$0xff] }
  0x81   :  { %325 = vmatmul.msk.f32.gmra.mxu1 %vm89_vm13, %v318_v54 }
  0x84   :  { %v370_v2 = vpop.permute.xlu1 %369 }
  0x85   :  { %v371_v5 = vunpack.i.l.bf16 %v370_v2  ;;  %v372_v21 = vunpack.i.h.bf16 %v370_v2 }
  0x86   :  { %v386_v26 = vpop.permute.xlu0 %385 }
  0x87   :  { %v184_v14 = vmul.f32 %v371_v5, %v183_v9  ;;  %v88_v28 = vmul.f32 %v372_v21, %v86_v61  ;;  %v387_v31 = vunpack.i.l.bf16 %v386_v26  ;;  %v388_v36 = vunpack.i.h.bf16 %v386_v26 }
  0x89   :  { %v185_v39 = vmul.f32 %v387_v31, %v183_v9  ;;  %v206_v42 = vmul.f32 %v388_v36, %v204_v10 }
  0x8c   :  { %v391_v34 = vpop.permute.xlu1 %390 }
  0x8d   :  { %v392_v40 = vunpack.i.l.bf16 %v391_v34  ;;  %v393_v43 = vunpack.i.h.bf16 %v391_v34 }
  0x8f   :  { %v227_v45 = vmul.f32 %v392_v40, %v225_v15  ;;  %v248_v47 = vmul.f32 %v393_v43, %v246_v22 }
  0xf5   :  { %v117_v3 = vpop.f32.mrf.mxu0 }
  0xf6   :  { %v118_v7 = vadd.f32 %v117_v3, %v87_v1  ;;  %v140_v8 = vpop.f32.mrf.mxu1 }
  0xf8   :  { %v141_v12 = vadd.f32 %v140_v8, %v118_v7 }
  0xfa   :  { %v165_v17 = vadd.f32 %v163_v4, %v141_v12 }
  0xfc   :  { %v186_v19 = vadd.f32 %v184_v14, %v165_v17 }
  0xfe   :  { %v207_v23 = vadd.f32 %v205_v16, %v186_v19  ;;  %v143_v35 = vpop.f32.mrf.mxu1 }
 0x100   :  { %v228_v25 = vadd.f32 %v226_v18, %v207_v23 }
 0x102   :  { %v249_v29 = vadd.f32 %v247_v24, %v228_v25 }
 0x103   :  { %v120_v30 = vpop.f32.mrf.mxu3 }
 0x104   :  { %v121_v32 = vadd.f32 %v120_v30, %v88_v28  ;;  %v251_v33 = vmax.f32 %v249_v29, 0.0 }
 0x106   :  { %v144_v38 = vadd.f32 %v143_v35, %v121_v32  ;;  %337 = vmatmul.msk.f32.vlgmr.msra.gmra.mxu2 %vm260_vm3, %v251_v33 }
 0x108   :  { %v166_v41 = vadd.f32 %v164_v37, %v144_v38 }
 0x10a   :  { %v187_v44 = vadd.f32 %v185_v39, %v166_v41 }
 0x10c   :  { %v208_v46 = vadd.f32 %v206_v42, %v187_v44 }
 0x10e   :  { %v229_v48 = vadd.f32 %v227_v45, %v208_v46 }
 0x110   :  { %v250_v49 = vadd.f32 %v248_v47, %v229_v48 }
 0x112   :  { %v252_v50 = vmax.f32 %v250_v49, 0.0 }
 0x114   :  { %338 = vmatmul.msk.f32.gmra.mxu2 %vm260_vm3, %v252_v50 }
 0x189   :  { %v288_v52 = vpop.f32.mrf.mxu2 }
 0x18a   :  { %v289_v53 = vadd.f32 %v394_v51, %v288_v52 }
 0x18c   :  { %295 = vst.msk [vmem:[#allocation2] sm:$0xff] %vm294_vm4, %v289_v53 }
 0x197   :  { %v291_v54 = vpop.f32.mrf.mxu2 }
 0x198   :  { %v292_v55 = vadd.f32 %v394_v51, %v291_v54 }
 0x19a   :  { %296 = vst.msk [vmem:[#allocation2 + $0x8] sm:$0xff] %vm294_vm4, %v292_v55 }
 0x19b   :  { %309 = dma.vmem_to_hbm [thread:$0]  %s302_s20, 256, %s304_s23, [#allocation3], %s425_s24, %s425_s24, %s426_s25  }
 0x19c   :  { %419 = dma.done.wait [#allocation3], 256  }
 0x19d   :  { %420 = vsyncadd [#allocation3], 4294967040 }
 0x19e   :  { %314 = vsyncpa [#allocation3], 1 }

</bundles_post_ra>
